<compile_context>
chip_gen: v6e
topology: v6e:2x2x1
jax: 0.10.0
libtpu: 0.0.40
codegen_flags: <defaults>
</compile_context>

<pallas_src>
import math

import jax
import jax.numpy as jnp
from jax.experimental import pallas as pl
from jax.experimental.pallas import tpu as pltpu

FREQ_EMB_SIZE = 256     # frequency_embedding_size (even; PyTorch odd-pad branch not needed)
HIDDEN_SIZE = 32        # hidden_size (small per instructions)
MAX_PERIOD = 10000.0


def _round_up(x, m):
    return ((x + m - 1) // m) * m


def _ceil_div(a, b):
    return -(-a // b)


def timestep_embedder_kernel(t_ref, freqs_ref, phase_ref, w1_ref, b1_ref,
                             w2_ref, b2_ref, o_ref):
    # t_ref:     (bn, 1)      f32 timesteps (rows beyond N are zero padding)
    # freqs_ref: (1, F)       f32 frequency table, duplicated: [f, f]
    # phase_ref: (1, F)       f32 phase: 0 for lanes [0, F/2), -pi/2 for [F/2, F)
    # w1_ref:    (F, H)       f32 first linear weight (original layout)
    # b1_ref:    (1, H)       f32
    # w2_ref:    (H, H)       f32 second linear weight
    # b2_ref:    (1, H)       f32
    # o_ref:     (bn, H)      f32 output block (masked vst; no padded slab)
    t = t_ref[...]                                        # (bn, 1)
    args = t * freqs_ref[...] + phase_ref[...]            # (bn, F)
    emb = jnp.cos(args)                                   # cos | sin (phase trick), (bn, F)

    # Single K=256 GEMM — full systolic depth on v6e/v7x, neutral on v5e.
    h = jnp.dot(emb, w1_ref[...], preferred_element_type=jnp.float32) + b1_ref[...]
    h = h * jax.nn.sigmoid(h)                             # SiLU, f32 on VPU/EUP

    out = jnp.dot(h, w2_ref[...], preferred_element_type=jnp.float32) + b2_ref[...]
    o_ref[...] = out.astype(o_ref.dtype)


def prepare_timestep_embedder_params(w1, b1, w2, b2, *, max_period=MAX_PERIOD):
    """One-time parameter prep (hoisted out of the per-call path).

    w1: (FREQ, H), b1: (H,), w2: (H, H), b2: (H,) — (in, out) layout so that
    y = x @ W + b matches nn.Linear's x @ W.T + b.
    """
    freq, hidden = w1.shape
    half = freq // 2
    base = jnp.exp(
        -math.log(max_period) * jnp.arange(half, dtype=jnp.float32) / half
    )
    freqs2 = jnp.concatenate([base, base]).reshape(1, freq)
    phase = jnp.concatenate([
        jnp.zeros((half,), jnp.float32),
        jnp.full((half,), -math.pi / 2.0, jnp.float32),
    ]).reshape(1, freq)
    return {
        "freqs": freqs2,
        "phase": phase,
        "w1": w1.astype(jnp.float32),
        "b1": b1.astype(jnp.float32).reshape(1, hidden),
        "w2": w2.astype(jnp.float32),
        "b2": b2.astype(jnp.float32).reshape(1, hidden),
    }


def timestep_embedder(t, params, *, row_block=1024):
    """t: (N,) float timesteps, params from prepare_timestep_embedder_params.

    Returns (N, H) f32, identical to TimestepEmbedder.forward.
    """
    n = t.shape[0]
    freq, hidden = params["w1"].shape

    # Row tiling:
    #  * n <= 128: single block (per-step overhead would eat any megacore win)
    #  * otherwise: balanced tiles, at least 2 (so v7x's 2nd TC gets work),
    #    each tile at most ~row_block rows, 8-aligned.
    if n <= 128:
        num_blocks = 1
    else:
        num_blocks = max(2, _ceil_div(n, row_block))
    block_n = _round_up(_ceil_div(n, num_blocks), 8)
    grid_n = _ceil_div(n, block_n)
    n_pad = grid_n * block_n

    t_f32 = t.astype(jnp.float32)
    if n_pad == n:
        t2d = t_f32.reshape(n, 1)
    else:
        t2d = jnp.zeros((n_pad, 1), jnp.float32).at[:n, 0].set(t_f32)

    # Advisory cost estimate (this kernel is launch/DMA-latency bound).
    flops = 2 * n_pad * (freq * hidden + hidden * hidden) + 2 * n_pad * freq \
        + 8 * n_pad * hidden
    transcendentals = n_pad * (freq + hidden)
    bytes_accessed = 4 * (t2d.size + 2 * freq + params["w1"].size
                          + params["b1"].size + params["w2"].size
                          + params["b2"].size + n_pad * hidden)

    out = pl.pallas_call(
        timestep_embedder_kernel,
        out_shape=jax.ShapeDtypeStruct((n_pad, hidden), jnp.float32),
        grid_spec=pltpu.PrefetchScalarGridSpec(
            num_scalar_prefetch=0,
            grid=(grid_n,),
            in_specs=[
                pl.BlockSpec((block_n, 1), lambda i: (i, 0)),
                pl.BlockSpec((1, freq), lambda i: (0, 0)),
                pl.BlockSpec((1, freq), lambda i: (0, 0)),
                pl.BlockSpec((freq, hidden), lambda i: (0, 0)),
                pl.BlockSpec((1, hidden), lambda i: (0, 0)),
                pl.BlockSpec((hidden, hidden), lambda i: (0, 0)),
                pl.BlockSpec((1, hidden), lambda i: (0, 0)),
            ],
            out_specs=pl.BlockSpec((block_n, hidden), lambda i: (i, 0)),
        ),
        compiler_params=pltpu.CompilerParams(
            dimension_semantics=("parallel",),   # shards row tiles across v7x's 2 TCs
        ),
        cost_estimate=pl.CostEstimate(
            flops=flops,
            transcendentals=transcendentals,
            bytes_accessed=bytes_accessed,
        ),
    )(t2d, params["freqs"], params["phase"], params["w1"], params["b1"],
      params["w2"], params["b2"])

    return out if n_pad == n else out[:n]


def reference(t, w1, b1, w2, b2, max_period=MAX_PERIOD):
    half = w1.shape[0] // 2
    freqs = jnp.exp(
        -math.log(max_period) * jnp.arange(half, dtype=jnp.float32) / half
    )
    args = t.astype(jnp.float32)[:, None] * freqs[None]
    emb = jnp.concatenate([jnp.cos(args), jnp.sin(args)], axis=-1)
    h = emb @ w1 + b1
    h = h * jax.nn.sigmoid(h)
    return h @ w2 + b2


if __name__ == "__main__":
    key = jax.random.PRNGKey(0)
    k_t, k_w1, k_b1, k_w2, k_b2, k_t2 = jax.random.split(key, 6)

    # Deterministic synthetic parameters (shapes from nn.Linear in __init__).
    w1 = jax.random.normal(k_w1, (FREQ_EMB_SIZE, HIDDEN_SIZE), jnp.float32) * 0.02
    b1 = jax.random.normal(k_b1, (HIDDEN_SIZE,), jnp.float32) * 0.02
    w2 = jax.random.normal(k_w2, (HIDDEN_SIZE, HIDDEN_SIZE), jnp.float32) * 0.02
    b2 = jax.random.normal(k_b2, (HIDDEN_SIZE,), jnp.float32) * 0.02

    # One-time parameter prep (hoisted out of the forward path).
    params = prepare_timestep_embedder_params(w1, b1, w2, b2)
    fwd = jax.jit(timestep_embedder)

    # Small batch (single-block path, no row padding).
    N = 8
    t = jax.random.uniform(k_t, (N,), jnp.float32, minval=0.0, maxval=1000.0)
    out = fwd(t, params)
    jax.block_until_ready(out)
    ref = reference(t, w1, b1, w2, b2)
    assert out.shape == (N, HIDDEN_SIZE)
    assert jnp.allclose(out, ref, atol=1e-4, rtol=1e-4)

    # Larger batch (exercises balanced 2-tile grid: 300 -> 2 x 152 rows).
    N2 = 300
    t2 = jax.random.uniform(k_t2, (N2,), jnp.float32, minval=0.0, maxval=1000.0)
    out2 = fwd(t2, params)
    jax.block_until_ready(out2)
    ref2 = reference(t2, w1, b1, w2, b2)
    assert out2.shape == (N2, HIDDEN_SIZE)
    assert jnp.allclose(out2, ref2, atol=1e-4, rtol=1e-4)

    print("KERNEL_OK")
</pallas_src>

<mosaic_0001>
module attributes {stable_mosaic.version = 11 : i64} {
  func.func @timestep_embedder_kernel(%arg0: i32, %arg1: memref<8x1xf32, #tpu.memory_space<vmem>>, %arg2: memref<1x256xf32, #tpu.memory_space<vmem>>, %arg3: memref<1x256xf32, #tpu.memory_space<vmem>>, %arg4: memref<256x32xf32, #tpu.memory_space<vmem>>, %arg5: memref<1x32xf32, #tpu.memory_space<vmem>>, %arg6: memref<32x32xf32, #tpu.memory_space<vmem>>, %arg7: memref<1x32xf32, #tpu.memory_space<vmem>>, %arg8: memref<8x32xf32, #tpu.memory_space<vmem>>) attributes {dimension_semantics = [#tpu.dimension_semantics<parallel>], iteration_bounds = array<i64: 1>, scalar_prefetch = 0 : i64, scratch_operands = 0 : i64, tpu.core_type = #tpu.core_type<tc>, window_params = [{transform_indices = @transform_0, window_bounds = array<i64: 8, 1>}, {pipeline_mode = #tpu.pipeline_mode<synchronous>, transform_indices = @transform_1, window_bounds = array<i64: 1, 256>}, {pipeline_mode = #tpu.pipeline_mode<synchronous>, transform_indices = @transform_2, window_bounds = array<i64: 1, 256>}, {pipeline_mode = #tpu.pipeline_mode<synchronous>, transform_indices = @transform_3, window_bounds = array<i64: 256, 32>}, {pipeline_mode = #tpu.pipeline_mode<synchronous>, transform_indices = @transform_4, window_bounds = array<i64: 1, 32>}, {pipeline_mode = #tpu.pipeline_mode<synchronous>, transform_indices = @transform_5, window_bounds = array<i64: 32, 32>}, {pipeline_mode = #tpu.pipeline_mode<synchronous>, transform_indices = @transform_6, window_bounds = array<i64: 1, 32>}, {transform_indices = @transform_7, window_bounds = array<i64: 8, 32>}]} {
    %c0 = arith.constant 0 : index
    %c0_0 = arith.constant 0 : index
    %0 = vector.load %arg1[%c0, %c0_0] : memref<8x1xf32, #tpu.memory_space<vmem>>, vector<8x1xf32>
    %c0_1 = arith.constant 0 : index
    %c0_2 = arith.constant 0 : index
    %1 = vector.load %arg2[%c0_1, %c0_2] : memref<1x256xf32, #tpu.memory_space<vmem>>, vector<1x256xf32>
    %2 = vector.broadcast %0 : vector<8x1xf32> to vector<8x256xf32>
    %3 = vector.broadcast %1 : vector<1x256xf32> to vector<8x256xf32>
    %4 = arith.mulf %2, %3 : vector<8x256xf32>
    %c0_3 = arith.constant 0 : index
    %c0_4 = arith.constant 0 : index
    %5 = vector.load %arg3[%c0_3, %c0_4] : memref<1x256xf32, #tpu.memory_space<vmem>>, vector<1x256xf32>
    %6 = vector.broadcast %5 : vector<1x256xf32> to vector<8x256xf32>
    %7 = arith.addf %4, %6 : vector<8x256xf32>
    %8 = math.cos %7 : vector<8x256xf32>
    %c0_5 = arith.constant 0 : index
    %c0_6 = arith.constant 0 : index
    %9 = vector.load %arg4[%c0_5, %c0_6] : memref<256x32xf32, #tpu.memory_space<vmem>>, vector<256x32xf32>
    %cst = arith.constant dense<0.000000e+00> : vector<8x32xf32>
    %10 = tpu.matmul %8, %9, %cst {dimension_numbers = #tpu.dot_dimension_numbers<[1], [0], [0], [1], [0, 0, 1, 1], [], []>} : vector<8x256xf32>, vector<256x32xf32>, vector<8x32xf32> -> vector<8x32xf32>
    %c0_7 = arith.constant 0 : index
    %c0_8 = arith.constant 0 : index
    %11 = vector.load %arg5[%c0_7, %c0_8] : memref<1x32xf32, #tpu.memory_space<vmem>>, vector<1x32xf32>
    %12 = vector.broadcast %11 : vector<1x32xf32> to vector<8x32xf32>
    %13 = arith.addf %10, %12 : vector<8x32xf32>
    %14 = arith.negf %13 : vector<8x32xf32>
    %15 = math.exp %14 : vector<8x32xf32>
    %cst_9 = arith.constant 1.000000e+00 : f32
    %16 = vector.broadcast %cst_9 : f32 to vector<8x32xf32>
    %17 = arith.addf %16, %15 : vector<8x32xf32>
    %18 = arith.divf %16, %17 : vector<8x32xf32>
    %19 = arith.mulf %13, %18 : vector<8x32xf32>
    %c0_10 = arith.constant 0 : index
    %c0_11 = arith.constant 0 : index
    %20 = vector.load %arg6[%c0_10, %c0_11] : memref<32x32xf32, #tpu.memory_space<vmem>>, vector<32x32xf32>
    %cst_12 = arith.constant dense<0.000000e+00> : vector<8x32xf32>
    %21 = tpu.matmul %19, %20, %cst_12 {dimension_numbers = #tpu.dot_dimension_numbers<[1], [0], [0], [1], [0, 0, 1, 1], [], []>} : vector<8x32xf32>, vector<32x32xf32>, vector<8x32xf32> -> vector<8x32xf32>
    %c0_13 = arith.constant 0 : index
    %c0_14 = arith.constant 0 : index
    %22 = vector.load %arg7[%c0_13, %c0_14] : memref<1x32xf32, #tpu.memory_space<vmem>>, vector<1x32xf32>
    %23 = vector.broadcast %22 : vector<1x32xf32> to vector<8x32xf32>
    %24 = arith.addf %21, %23 : vector<8x32xf32>
    %c0_15 = arith.constant 0 : index
    %c0_16 = arith.constant 0 : index
    %25 = vector.load %arg8[%c0_15, %c0_16] : memref<8x32xf32, #tpu.memory_space<vmem>>, vector<8x32xf32>
    tpu.vector_store %arg8[%c0_15, %c0_16], %24 {strides = array<i32>} : memref<8x32xf32, #tpu.memory_space<vmem>>, vector<8x32xf32>,
    return
  }
  func.func @transform_0(%arg0: i32) -> (i32, i32) {
    %c0_i32 = arith.constant 0 : i32
    %c0_i32_0 = arith.constant 0 : i32
    return %arg0, %c0_i32 : i32, i32
  }
  func.func @transform_1(%arg0: i32) -> (i32, i32) {
    %c0_i32 = arith.constant 0 : i32
    %c0_i32_0 = arith.constant 0 : i32
    %c0_i32_1 = arith.constant 0 : i32
    return %c0_i32, %c0_i32_0 : i32, i32
  }
  func.func @transform_2(%arg0: i32) -> (i32, i32) {
    %c0_i32 = arith.constant 0 : i32
    %c0_i32_0 = arith.constant 0 : i32
    %c0_i32_1 = arith.constant 0 : i32
    return %c0_i32, %c0_i32_0 : i32, i32
  }
  func.func @transform_3(%arg0: i32) -> (i32, i32) {
    %c0_i32 = arith.constant 0 : i32
    %c0_i32_0 = arith.constant 0 : i32
    %c0_i32_1 = arith.constant 0 : i32
    return %c0_i32, %c0_i32_0 : i32, i32
  }
  func.func @transform_4(%arg0: i32) -> (i32, i32) {
    %c0_i32 = arith.constant 0 : i32
    %c0_i32_0 = arith.constant 0 : i32
    %c0_i32_1 = arith.constant 0 : i32
    return %c0_i32, %c0_i32_0 : i32, i32
  }
  func.func @transform_5(%arg0: i32) -> (i32, i32) {
    %c0_i32 = arith.constant 0 : i32
    %c0_i32_0 = arith.constant 0 : i32
    %c0_i32_1 = arith.constant 0 : i32
    return %c0_i32, %c0_i32_0 : i32, i32
  }
  func.func @transform_6(%arg0: i32) -> (i32, i32) {
    %c0_i32 = arith.constant 0 : i32
    %c0_i32_0 = arith.constant 0 : i32
    %c0_i32_1 = arith.constant 0 : i32
    return %c0_i32, %c0_i32_0 : i32, i32
  }
  func.func @transform_7(%arg0: i32) -> (i32, i32) {
    %c0_i32 = arith.constant 0 : i32
    %c0_i32_0 = arith.constant 0 : i32
    return %arg0, %c0_i32 : i32, i32
  }
}

</mosaic_0001>

<bundles_post_ra>
// kernel: timestep_embedder.1
= control target key start
LH: loop header
LB: loop body
LE: loop exit
PB: predicated region body
PF: predicated region fallthrough
CT: control target
= control target key end

     0   :  { %v599_v1 = vmov 0   ;;  %s857_s0 = inlined_call_operand.vmem [shape: f32[8,1], index: 0, kind: input, shape index: {}]   ;;  %s858_s1 = inlined_call_operand.vmem [shape: f32[1,256], index: 1, kind: input, shape index: {}]   ;;  %s859_s2 = inlined_call_operand.vmem [shape: f32[1,256], index: 2, kind: input, shape index: {}]   ;;  %s860_s3 = inlined_call_operand.vmem [shape: f32[256,32], index: 3, kind: input, shape index: {}]   ;;  %s861_s4 = inlined_call_operand.vmem [shape: f32[1,32], index: 4, kind: input, shape index: {}]   ;;  %s862_s5 = inlined_call_operand.vmem [shape: f32[32,32], index: 5, kind: input, shape index: {}]   ;;  %s863_s6 = inlined_call_operand.vmem [shape: f32[1,32], index: 6, kind: input, shape index: {}]   ;;  %s864_s7 = inlined_call_operand.hbm [shape: f32[8,32], index: 7, kind: output, shape index: {}]  }
   0x1   :  { %v27_v0 = vld [vmem:[%s857_s0] sm:$0xff]  ;;  %564 = vset.pattern.permute.xlu0 %v599_v1 }
   0x2   :  { %12 = vsyncpa [#allocation3], 0  ;;  %31 = vperm.xlu0 %564, %v27_v0   ;;  %v298_v2 = vld [vmem:[%s860_s3 + $0xf8] sm:$0xff]  ;;  %v297_v4 = vld [vmem:[%s860_s3 + $0xf0] sm:$0xff]  ;;  %v35_v34 = vlaneseq  ;;  %s608_s30 = smov [#allocation2]  }
   0x3   :  { %v282_v3 = vld [vmem:[%s860_s3 + $0x78] sm:$0xff]  ;;  %495 = vmatprep.subr.mxu0 %v298_v2  ;;  %v281_v5 = vld [vmem:[%s860_s3 + $0x70] sm:$0xff]  ;;  %v296_v6 = vld [vmem:[%s860_s3 + $0xe8] sm:$0xff]  ;;  %s475_s8 = sshll.u32 %s608_s30, 4  ;;  %s476_s8 = int_to_ptr.vmem [resolvable:$true] %s475_s8 }
   0x4   :  { %496 = vmatpush3.msra.mxu0 %v282_v3  ;;  %v280_v7 = vld [vmem:[%s860_s3 + $0x68] sm:$0xff]  ;;  %v295_v8 = vld [vmem:[%s860_s3 + $0xe0] sm:$0xff]  ;;  %v294_v10 = vld [vmem:[%s860_s3 + $0xd8] sm:$0xff]  ;;  %v36_v35 = vshrl.u32 %v35_v34, 7  ;;  %p582_p1 = scmp.lt.s32.totalorder %s476_s8, %s476_s8 }
   0x5   :  { %497 = vmatprep.subr.mxu0 %v297_v4  ;;  %v279_v9 = vld [vmem:[%s860_s3 + $0x60] sm:$0xff]  ;;  %v278_v11 = vld [vmem:[%s860_s3 + $0x58] sm:$0xff]  ;;  %v293_v12 = vld [vmem:[%s860_s3 + $0xd0] sm:$0xff] }
   0x6   :  { %498 = vmatpush3.msra.mxu0 %v281_v5  ;;  %v277_v13 = vld [vmem:[%s860_s3 + $0x50] sm:$0xff]  ;;  %v292_v14 = vld [vmem:[%s860_s3 + $0xc8] sm:$0xff]  ;;  %v291_v16 = vld [vmem:[%s860_s3 + $0xc0] sm:$0xff]  ;;  %v37_v36 = vsub.s32 0, %v36_v35  ;;  %v41_v37 = vsub.s32 1, %v36_v35 }
   0x7   :  { %499 = vmatprep.subr.mxu0 %v296_v6  ;;  %v276_v15 = vld [vmem:[%s860_s3 + $0x48] sm:$0xff]  ;;  %v275_v17 = vld [vmem:[%s860_s3 + $0x40] sm:$0xff]  ;;  %v290_v18 = vld [vmem:[%s860_s3 + $0xb8] sm:$0xff] }
   0x8   :  { %500 = vmatpush3.msra.mxu0 %v280_v7  ;;  %v274_v19 = vld [vmem:[%s860_s3 + $0x38] sm:$0xff]  ;;  %v289_v20 = vld [vmem:[%s860_s3 + $0xb0] sm:$0xff]  ;;  %v288_v22 = vld [vmem:[%s860_s3 + $0xa8] sm:$0xff] }
   0x9   :  { %501 = vmatprep.subr.mxu0 %v295_v8  ;;  %v273_v21 = vld [vmem:[%s860_s3 + $0x30] sm:$0xff]  ;;  %v272_v23 = vld [vmem:[%s860_s3 + $0x28] sm:$0xff]  ;;  %v287_v24 = vld [vmem:[%s860_s3 + $0xa0] sm:$0xff] }
   0xa   :  { %502 = vmatpush3.msra.mxu0 %v279_v9  ;;  %v271_v25 = vld [vmem:[%s860_s3 + $0x20] sm:$0xff]  ;;  %v286_v26 = vld [vmem:[%s860_s3 + $0x98] sm:$0xff]  ;;  %v285_v28 = vld [vmem:[%s860_s3 + $0x90] sm:$0xff]  ;;  %v600_v9 = vmov 683565275  }
   0xb   :  { %503 = vmatprep.subr.mxu0 %v294_v10  ;;  %v270_v27 = vld [vmem:[%s860_s3 + $0x18] sm:$0xff]  ;;  %v269_v29 = vld [vmem:[%s860_s3 + $0x10] sm:$0xff]  ;;  %v284_v30 = vld [vmem:[%s860_s3 + $0x88] sm:$0xff] }
   0xc   :  { %504 = vmatpush3.msra.mxu0 %v278_v11  ;;  %v268_v31 = vld [vmem:[%s860_s3 + $0x8] sm:$0xff]  ;;  %v283_v32 = vld [vmem:[%s860_s3 + $0x80] sm:$0xff]  ;;  %v601_v11 = vmov 2475754826  }
   0xd   :  { %505 = vmatprep.subr.mxu0 %v293_v12  ;;  %v267_v33 = vld [vmem:[%s860_s3] sm:$0xff] }
   0xe   :  { %506 = vmatpush3.msra.mxu0 %v277_v13  ;;  %v28_v38 = vld [vmem:[%s858_s1] sm:$0x3]  ;;  %v602_v13 = vmov 2131351028  }
   0xf   :  { %507 = vmatprep.subr.mxu0 %v292_v14  ;;  %v47_v39 = vld [vmem:[%s859_s2] sm:$0x3]  ;;  %v38_v40 = vrot.slane %v28_v38, %v37_v36  ;;  %v42_v41 = vrot.slane %v28_v38, %v41_v37 }
  0x10   :  { %508 = vmatpush3.msra.mxu0 %v276_v15  ;;  %v52_v42 = vrot.slane %v47_v39, %v37_v36  ;;  %v56_v43 = vrot.slane %v47_v39, %v41_v37 }
  0x11   :  { %509 = vmatprep.subr.mxu0 %v291_v16 }
  0x12   :  { %510 = vmatpush3.msra.mxu0 %v275_v17  ;;  %v603_v17 = vmov 2102212464  }
  0x13   :  { %511 = vmatprep.subr.mxu0 %v290_v18 }
  0x14   :  { %512 = vmatpush3.msra.mxu0 %v274_v19 }
  0x15   :  { %513 = vmatprep.subr.mxu0 %v289_v20  ;;  %v604_v20 = vmov 920167782  }
  0x16   :  { %514 = vmatpush3.msra.mxu0 %v273_v21 }
  0x17   :  { %515 = vmatprep.subr.mxu0 %v288_v22 }
  0x18   :  { %516 = vmatpush3.msra.mxu0 %v272_v23  ;;  %v605_v23 = vmov 1326507024  }
  0x19   :  { %517 = vmatprep.subr.mxu0 %v287_v24 }
  0x1a   :  { %518 = vmatpush3.msra.mxu0 %v271_v25 }
  0x1b   :  { %519 = vmatprep.subr.mxu0 %v286_v26 }
  0x1c   :  { %520 = vmatpush3.msra.mxu0 %v270_v27 }
  0x1d   :  { %521 = vmatprep.subr.mxu0 %v285_v28 }
  0x1e   :  { %522 = vmatpush3.msra.mxu0 %v269_v29 }
  0x1f   :  { %523 = vmatprep.subr.mxu0 %v284_v30 }
  0x20   :  { %524 = vmatpush3.msra.mxu0 %v268_v31 }
  0x21   :  { %525 = vmatprep.subr.mxu0 %v283_v32 }
  0x22   :  { %526 = vmatpush3.msra.mxu0 %v267_v33 }
  0x7d   :  { %v32_v44 = vpop.permute.xlu0 %31 }
  0x7e   :  { %v45_v45 = vmul.f32 %v38_v40, %v32_v44  ;;  %v46_v46 = vmul.f32 %v42_v41, %v32_v44 }
  0x80   :  { %v754_v47 = vadd.f32 %v52_v42, %v45_v45  ;;  %v756_v48 = vadd.f32 %v56_v43, %v46_v46 }
  0x82   :  { %v64_v49 = vand.u32 2139095040, %v754_v47  ;;  %v167_v50 = vand.u32 2139095040, %v756_v48  ;;  %v164_v51 = vand.u32 2147483647, %v756_v48  ;;  %v61_v52 = vand.u32 2147483647, %v754_v47 }
  0x83   :  { %vm166_vm14 = vcmp.lt.s32.totalorder %v756_v48, 0 }
  0x84   :  { %v65_v53 = vshrl.u32 %v64_v49, 23  ;;  %v168_v54 = vshrl.u32 %v167_v50, 23  ;;  %v171_v57 = vand.u32 8388607, %v164_v51  ;;  %v68_v58 = vand.u32 8388607, %v61_v52 }
  0x85   :  { %vm813_vm15 = vcmp.le.f32.partialorder %v164_v51, 0.7853982 }
  0x86   :  { %v483_v55 = vadd.s32 4294967169, %v65_v53  ;;  %v487_v56 = vadd.s32 4294967169, %v168_v54  ;;  %v172_v61 = vor.u32 8388608, %v171_v57  ;;  %v69_v62 = vor.u32 8388608, %v68_v58 }
  0x88   :  { %v71_v59 = vadd.s32 1, %v483_v55  ;;  %v174_v60 = vadd.s32 1, %v487_v56  ;;  %v770_v6 = vshll.u32 %v172_v61, 8  ;;  %v772_v7 = vshll.u32 %v69_v62, 8 }
  0x8a   :  { %vm72_vm0 = vcmp.gt.s32.totalorder %v71_v59, 0  ;;  %vm175_vm1 = vcmp.gt.s32.totalorder %v174_v60, 0 }
  0x8b   :  { %v73_v63 = vsel %vm72_vm0, %v71_v59, 0  ;;  %v176_v0 = vsel %vm175_vm1, %v174_v60, 0  ;;  %vm63_vm0 = vcmp.lt.s32.totalorder %v754_v47, 0  ;;  %vm823_vm1 = vcmp.le.f32.partialorder %v61_v52, 0.7853982 }
  0x8c   :  { %v766_v1 = vand.u32 31, %v73_v63  ;;  %v178_v2 = vand.u32 31, %v176_v0  ;;  %v177_v3 = vshrl.u32 %v176_v0, 5  ;;  %v768_v4 = vshrl.u32 %v73_v63, 5 }
  0x8e   :  { %v179_v5 = vsub.s32 32, %v178_v2  ;;  %v76_v8 = vsub.s32 32, %v766_v1  ;;  %v181_v10 = vshll.u32 %v600_v9, %v178_v2  ;;  %v184_v12 = vshll.u32 %v601_v11, %v178_v2 }
  0x8f   :  { %v187_v14 = vshll.u32 %v602_v13, %v178_v2  ;;  %v190_v19 = vshll.u32 %v603_v17, %v178_v2  ;;  %v193_v22 = vshll.u32 %v604_v20, %v178_v2  ;;  %vm196_vm2 = vcmp.lt.s32.totalorder %v177_v3, 1 }
  0x90   :  { %v182_v15 = vshrl.u32 %v601_v11, %v179_v5  ;;  %v185_v16 = vshrl.u32 %v602_v13, %v179_v5  ;;  %v188_v18 = vshrl.u32 %v603_v17, %v179_v5  ;;  %v191_v21 = vshrl.u32 %v604_v20, %v179_v5 }
  0x91   :  { %v194_v24 = vshrl.u32 %v605_v23, %v179_v5  ;;  %v180_v25 = vshrl.u32 %v600_v9, %v179_v5  ;;  %vm198_vm3 = vcmp.lt.s32.totalorder %v177_v3, 3  ;;  %vm199_vm4 = vcmp.lt.s32.totalorder %v177_v3, 4 }
  0x92   :  { %v183_v26 = vor.u32 %v182_v15, %v181_v10  ;;  %v186_v27 = vor.u32 %v185_v16, %v184_v12  ;;  %v189_v28 = vor.u32 %v188_v18, %v187_v14  ;;  %v192_v29 = vor.u32 %v191_v21, %v190_v19 }
  0x93   :  { %v195_v30 = vor.u32 %v194_v24, %v193_v22  ;;  %v79_v38 = vshrl.u32 %v601_v11, %v76_v8  ;;  %vm197_vm5 = vcmp.lt.s32.totalorder %v177_v3, 2  ;;  %v78_v41 = vshll.u32 %v600_v9, %v766_v1 }
  0x94   :  { %v200_v31 = vsel %vm196_vm2, %v180_v25, %v183_v26  ;;  %v201_v32 = vsel %vm199_vm4, %v189_v28, 2102212464  ;;  %v204_v33 = vsel %vm196_vm2, %v183_v26, %v186_v27  ;;  %v208_v34 = vsel %vm196_vm2, %v186_v27, %v189_v28 }
  0x95   :  { %v202_v35 = vsel %vm198_vm3, %v186_v27, %v201_v32  ;;  %v205_v36 = vsel %vm199_vm4, %v192_v29, 920167782  ;;  %v209_v37 = vsel %vm199_vm4, %v195_v30, 1326507024  ;;  %v81_v45 = vshll.u32 %v601_v11, %v766_v1 }
  0x96   :  { %v206_v39 = vsel %vm198_vm3, %v189_v28, %v205_v36  ;;  %v210_v40 = vsel %vm198_vm3, %v192_v29, %v209_v37  ;;  %v203_v42 = vsel %vm197_vm5, %v200_v31, %v202_v35  ;;  %v80_v54 = vor.u32 %v79_v38, %v78_v41 }
  0x97   :  { %v207_v43 = vsel %vm197_vm5, %v204_v33, %v206_v39  ;;  %v211_v44 = vsel %vm197_vm5, %v208_v34, %v210_v40  ;;  %v82_v55 = vshrl.u32 %v602_v13, %v76_v8  ;;  %v84_v56 = vshll.u32 %v602_v13, %v766_v1 }
  0x98   :  { %v778_v46 = vmul.u32.u64.low %v770_v6, %v211_v44  ;;  %v779_v49 = vmul.u32.u64.high %v770_v6, %v211_v44, %v778_v46  ;;  %v782_v50 = vmul.u32.u64.low %v770_v6, %v207_v43  ;;  %v783_v53 = vmul.u32.u64.high %v770_v6, %v207_v43, %v782_v50 }
  0x99   :  { %v85_v57 = vshrl.u32 %v603_v17, %v76_v8  ;;  %v77_v58 = vshrl.u32 %v600_v9, %v76_v8  ;;  %v87_v59 = vshll.u32 %v603_v17, %v766_v1  ;;  %v88_v60 = vshrl.u32 %v604_v20, %v76_v8 }
  0x9a   :  { %v91_v61 = vshrl.u32 %v605_v23, %v76_v8  ;;  %v219_v62 = vmul.u32 %v770_v6, %v203_v42  ;;  %v83_v63 = vor.u32 %v82_v55, %v81_v45  ;;  %v90_v2 = vshll.u32 %v604_v20, %v766_v1 }
  0x9b   :  { %v86_v0 = vor.u32 %v85_v57, %v84_v56  ;;  %vm221_vm6 = vc.u32 %v779_v49, %v782_v50  ;;  %v222_v3 = vadd.s32 1, %v783_v53  ;;  %v89_v5 = vor.u32 %v88_v60, %v87_v59 }
  0x9c   :  { %vm93_vm7 = vcmp.lt.s32.totalorder %v768_v4, 1  ;;  %v92_v10 = vor.u32 %v91_v61, %v90_v2  ;;  %vm95_vm8 = vcmp.lt.s32.totalorder %v768_v4, 3  ;;  %vm96_vm9 = vcmp.lt.s32.totalorder %v768_v4, 4 }
  0x9d   :  { %v101_v9 = vsel %vm93_vm7, %v80_v54, %v83_v63  ;;  %v223_v8 = vsel %vm221_vm6, %v222_v3, %v783_v53  ;;  %v98_v6 = vsel %vm96_vm9, %v86_v0, 2102212464  ;;  %v102_v11 = vsel %vm96_vm9, %v89_v5, 920167782 }
  0x9e   :  { %v105_v12 = vsel %vm93_vm7, %v83_v63, %v86_v0  ;;  %v224_v13 = vadd.s32 %v223_v8, %v219_v62  ;;  %vm94_vm10 = vcmp.lt.s32.totalorder %v768_v4, 2  ;;  %v103_v1 = vsel %vm95_vm8, %v86_v0, %v102_v11 }
  0x9f   :  { %v106_v14 = vsel %vm96_vm9, %v92_v10, 1326507024  ;;  %v97_v15 = vsel %vm93_vm7, %v77_v58, %v80_v54  ;;  %v99_v16 = vsel %vm95_vm8, %v83_v63, %v98_v6  ;;  %v104_v17 = vsel %vm94_vm10, %v101_v9, %v103_v1 }
  0xa0   :  { %v107_v18 = vsel %vm95_vm8, %v89_v5, %v106_v14  ;;  %v225_v19 = vadd.s32 536870912, %v224_v13  ;;  %v797_v21 = vmul.u32.u64.low %v772_v7, %v104_v17  ;;  %v798_v22 = vmul.u32.u64.high %v772_v7, %v104_v17, %v797_v21 }
  0xa1   :  { %v108_v20 = vsel %vm94_vm10, %v105_v12, %v107_v18  ;;  %v100_v26 = vsel %vm94_vm10, %v97_v15, %v99_v16  ;;  %v220_v42 = vadd.s32 %v782_v50, %v779_v49  ;;  %vm256_vm5 = vweird.f32 %v756_v48 }
  0xa2   :  { %v801_v23 = vmul.u32.u64.low %v772_v7, %v108_v20  ;;  %v802_v24 = vmul.u32.u64.high %v772_v7, %v108_v20, %v801_v23  ;;  %v226_v25 = vshrl.u32 %v225_v19, 30  ;;  %v119_v4 = vadd.s32 1, %v798_v22 }
  0xa3   :  { %v116_v28 = vmul.u32 %v772_v7, %v100_v26  ;;  %vm153_vm9 = vweird.f32 %v754_v47  ;;  %vm607_vm10 = vmmov 0  }
  0xa4   :  { %v227_v27 = vshll.u32 %v226_v25, 30  ;;  %vm118_vm11 = vc.u32 %v802_v24, %v797_v21  ;;  %v117_v62 = vadd.s32 %v797_v21, %v802_v24 }
  0xa5   :  { %v120_v30 = vsel %vm118_vm11, %v119_v4, %v798_v22  ;;  %vm394_vm11 = vcmask 261120  }
  0xa6   :  { %v228_v29 = vsub.s32 %v224_v13, %v227_v27  ;;  %v121_v31 = vadd.s32 %v120_v30, %v116_v28  ;;  %v250_v13 = vsub.s32 4, %v226_v25 }
  0xa8   :  { %v230_v32 = vsub.s32 0, %v228_v29  ;;  %v122_v33 = vadd.s32 536870912, %v121_v31  ;;  %v251_v16 = vsel %vm166_vm14, %v250_v13, %v226_v25 }
  0xa9   :  { %v253_v19 = vsel %vm813_vm15, 0, %v251_v16 }
  0xaa   :  { %v488_v34 = vmin.u32 %v230_v32, %v228_v29  ;;  %v123_v35 = vshrl.u32 %v122_v33, 30  ;;  %v257_v22 = vand.u32 3, %v253_v19 }
  0xac   :  { %v232_v36 = vclz %v488_v34  ;;  %v124_v37 = vshll.u32 %v123_v35, 30  ;;  %v147_v21 = vsub.s32 4, %v123_v35  ;;  %vm262_vm2 = vcmp.eq.s32.totalorder %v257_v22, 2 }
  0xad   :  { %vm259_vm3 = vcmp.eq.s32.totalorder %v257_v22, 0  ;;  %vm258_vm4 = vcmp.lt.s32.totalorder %v257_v22, 2 }
  0xae   :  { %v489_v38 = vadd.s32 4294967294, %v232_v36  ;;  %v125_v39 = vsub.s32 %v121_v31, %v124_v37  ;;  %v148_v26 = vsel %vm63_vm0, %v147_v21, %v123_v35 }
  0xaf   :  { %v150_v28 = vsel %vm823_vm1, 0, %v148_v26 }
  0xb0   :  { %vm490_vm12 = vcmp.lt.s32.totalorder %v489_v38, 0  ;;  %v127_v41 = vsub.s32 0, %v125_v39  ;;  %v154_v31 = vand.u32 3, %v150_v28 }
  0xb1   :  { %v235_v40 = vsel %vm490_vm12, 0, %v489_v38 }
  0xb2   :  { %v236_v7 = vsub.s32 32, %v235_v40  ;;  %v240_v43 = vsub.s32 4294967266, %v235_v40  ;;  %v484_v44 = vmin.u32 %v127_v41, %v125_v39  ;;  %v237_v45 = vshll.u32 %v228_v29, %v235_v40  ;;  %v385_v41 = vld [vmem:[%s862_s5 + $0x10] sm:$0xff] }
  0xb3   :  { %vm159_vm6 = vcmp.eq.s32.totalorder %v154_v31, 2  ;;  %vm156_vm7 = vcmp.eq.s32.totalorder %v154_v31, 0  ;;  %vm155_vm8 = vcmp.lt.s32.totalorder %v154_v31, 2  ;;  %v606_v40 = vmov 0.0  }
  0xb4   :  { %v238_v46 = vshrl.u32 %v220_v42, %v236_v7  ;;  %v241_v53 = vadd.s32 127, %v240_v43  ;;  %v129_v54 = vclz %v484_v44  ;;  %535 = vmatprep.subr.mxu1 %v606_v40  ;;  %v384_v42 = vld [vmem:[%s862_s5 + $0x8] sm:$0xff]  ;;  %543 = vmatprep.mubr.msk.f32.mxu1 %vm607_vm10, %v606_v40  ;;  %v491_v43 = vld [vmem:[%s861_s4] ss:$0 sm:$0xff]  ;;  %s577_s4 = scalar_lea.vmem %s476_s8, 128 }
  0xb5   :  { %p578_p0 = scmp.ne.s32.totalorder %s476_s8, %s577_s4  ;;  %p583_p2 = scmp.lt.s32.totalorder %s577_s4, %s577_s4 }
  0xb6   :  { %v239_v55 = vor.u32 %v238_v46, %v237_v45  ;;  %v242_v56 = vshll.u32 %v241_v53, 23  ;;  %v485_v57 = vadd.s32 4294967294, %v129_v54 }
  0xb7   :  { %p584_p3 = por %p583_p2, %p582_p1 }
  0xb8   :  { %v243_v58 = vor.u32 4788187, %v242_v56  ;;  %vm486_vm13 = vcmp.lt.s32.totalorder %v485_v57, 0  ;;  %v246_v60 = vcvt.s32.f32 %v239_v55 }
  0xb9   :  { %v132_v61 = vsel %vm486_vm13, 0, %v485_v57  ;;  %p585_p4 = pnand %p584_p3, %p578_p0 }
  0xba   :  { %v244_v59 = vand.u32 2147483647, %v243_v58  ;;  %v133_v63 = vsub.s32 32, %v132_v61  ;;  %v137_v0 = vsub.s32 4294967266, %v132_v61  ;;  %v134_v50 = vshll.u32 %v125_v39, %v132_v61  ;;  %v493_v58 = vld [vmem:[%s863_s6] ss:$0 sm:$0xff] }
  0xbc   :  { %v247_v49 = vmul.f32 %v246_v60, %v244_v59  ;;  %v135_v2 = vshrl.u32 %v117_v62, %v133_v63  ;;  %v138_v3 = vadd.s32 127, %v137_v0 }
  0xbe   :  { %v248_v5 = vxor.u32 2147483648, %v247_v49  ;;  %v136_v10 = vor.u32 %v135_v2, %v134_v50  ;;  %v139_v9 = vshll.u32 %v138_v3, 23 }
  0xc0   :  { %v249_v6 = vsel %vm166_vm14, %v248_v5, %v247_v49  ;;  %v140_v12 = vor.u32 4788187, %v139_v9  ;;  %v143_v14 = vcvt.s32.f32 %v136_v10 }
  0xc1   :  { %v252_v11 = vsel %vm813_vm15, %v756_v48, %v249_v6  ;;  %v386_v48 = vld [vmem:[%s862_s5 + $0x18] sm:$0xff] }
  0xc2   :  { %565 = vcosq.f32 %v252_v11  ;;  %v141_v1 = vand.u32 2147483647, %v140_v12  ;;  %536 = vmatpush3.msra.mxu1 %v386_v48 }
  0xc3   :  { %567 = vsinq.f32 %v252_v11  ;;  %537 = vmatprep.subr.mxu1 %v606_v40 }
  0xc4   :  { %v144_v15 = vmul.f32 %v143_v14, %v141_v1  ;;  %538 = vmatpush3.msra.mxu1 %v385_v41 }
  0xc5   :  { %539 = vmatprep.subr.mxu1 %v606_v40 }
  0xc6   :  { %v145_v17 = vxor.u32 2147483648, %v144_v15  ;;  %540 = vmatpush3.msra.mxu1 %v384_v42 }
  0xc7   :  { %541 = vmatprep.subr.mxu1 %v606_v40 }
  0xc8   :  { %v146_v18 = vsel %vm63_vm0, %v145_v17, %v144_v15 }
  0xc9   :  { %v149_v20 = vsel %vm823_vm1, %v754_v47, %v146_v18  ;;  %v383_v47 = vld [vmem:[%s862_s5] sm:$0xff] }
  0xca   :  { %569 = vcosq.f32 %v149_v20  ;;  %542 = vmatpush3.msra.mxu1 %v383_v47 }
  0xcb   :  { %571 = vsinq.f32 %v149_v20 }
  0xcf   :  { %v566_v23 = vpop.eup %565 }
  0xd0   :  { %v568_v24 = vpop.eup %567  ;;  %v263_v25 = vxor.u32 2147483648, %v566_v23 }
  0xd1   :  { %v260_v52 = vxor.u32 2147483648, %v568_v24 }
  0xd2   :  { %v264_v27 = vsel %vm262_vm2, %v263_v25, %v568_v24 }
  0xd3   :  { %v261_v4 = vsel %vm259_vm3, %v566_v23, %v260_v52 }
  0xd4   :  { %v265_v29 = vsel %vm258_vm4, %v261_v4, %v264_v27 }
  0xd5   :  { %v266_v30 = vsel %vm256_vm5, nan, %v265_v29 }
  0xd6   :  { %370 = vmatprep.mubr.f32.mxu0 %v266_v30 }
  0xd7   :  { %v570_v32 = vpop.eup %569 }
  0xd8   :  { %v572_v33 = vpop.eup %571  ;;  %v160_v34 = vxor.u32 2147483648, %v570_v32 }
  0xd9   :  { %v157_v36 = vxor.u32 2147483648, %v572_v33 }
  0xda   :  { %v161_v35 = vsel %vm159_vm6, %v160_v34, %v572_v33 }
  0xdb   :  { %v158_v37 = vsel %vm156_vm7, %v570_v32, %v157_v36 }
  0xdc   :  { %v162_v38 = vsel %vm155_vm8, %v158_v37, %v161_v35 }
  0xdd   :  { %v163_v39 = vsel %vm153_vm9, nan, %v162_v38 }
  0xde   :  { %371 = vmatmul.mubr.f32.vlgmr.msra.gmra.mxu0 %v163_v39 }
 0x19e   :  { %v527_v7 = vpop.f32.mrf.mxu0 }
 0x1a0   :  { %v528_v44 = vpop.f32.mrf.mxu0 }
 0x1a1   :  { %v529_v45 = vadd.f32 %v528_v44, %v527_v7 }
 0x1a3   :  { %v373_v46 = vadd.f32 %v529_v45, %v491_v43 }
 0x1a5   :  { %v492_v53 = vmul.f32 -1.442695, %v373_v46 }
 0x1a7   :  { %573 = vpow2.f32 %v492_v53 }
 0x1b4   :  { %v574_v54 = vpop.eup %573 }
 0x1b5   :  { %v379_v55 = vadd.f32 1.0, %v574_v54 }
 0x1b7   :  { %575 = vrcp.f32 %v379_v55 }
 0x1c4   :  { %v576_v56 = vpop.eup %575 }
 0x1c5   :  { %v382_v57 = vmul.f32 %v576_v56, %v373_v46 }
 0x1c7   :  { %544 = vmatmul.mubr.msk.f32.vlgmr.msra.gmra.mxu1 %vm394_vm11, %v382_v57 }
 0x287   :  { %v464_v59 = vpop.f32.mrf.mxu1 }
 0x288   :  { %v465_v60 = vadd.f32 %v493_v58, %v464_v59 }
 0x289   :  { %v545_v61 = vpop.f32.mrf.mxu1 }
 0x28a   :  { %468 = vst.msk [vmem:[#allocation2] sm:$0xff] %vm394_vm11, %v465_v60 }
 0x28b   :  { %588 = shalt.err (!%p585_p4)
}
 0x28c   :  { %478 = dma.vmem_to_hbm [thread:$0]  %s476_s8, 128, %s864_s7, [#allocation3]  }
 0x28d   :  { %597 = dma.done.wait [#allocation3], 128  }
 0x28e   :  { %598 = vsyncadd [#allocation3], 4294967168 }
 0x28f   :  { %482 = vsyncpa [#allocation3], 1 }

</bundles_post_ra>
